<compile_context>
chip_gen: v7x
topology: tpu7x:2x2x1
jax: 0.10.0
libtpu: 0.0.40
codegen_flags: <defaults>
</compile_context>

<pallas_src>
import functools

import jax
import jax.numpy as jnp
from jax import lax
from jax.experimental import pallas as pl
from jax.experimental.pallas import tpu as pltpu


def _cdiv(a: int, b: int) -> int:
    return -(-a // b)


def _round_up(a: int, m: int) -> int:
    return _cdiv(a, m) * m


def _sumsq_kernel(x_ref, o_ref, *, nchunks: int):
    """Lane-wise partial sum of squares, accumulated into the output block.

    x_ref: (row_tile, thw)  input tile (any float dtype, upcast to f32)
    o_ref: (row_tile, 128)  resident f32 lane-wise accumulator (output block)
    """
    k = pl.program_id(2)

    @pl.when(k == 0)
    def _():
        o_ref[...] = jnp.zeros_like(o_ref)

    # Pure vld + VPU multiply-add on 128-lane chunks; no cross-lane (XLU)
    # work anywhere in the kernel.
    def body(j, acc):
        start = pl.multiple_of(j * 128, 128)
        c = x_ref[:, pl.ds(start, 128)].astype(jnp.float32)
        return acc + c * c

    partial = lax.fori_loop(
        0, nchunks, body,
        jnp.zeros(o_ref.shape, jnp.float32),
        unroll=min(nchunks, 16),
    )
    o_ref[...] += partial


def l_color(x: jax.Array) -> jax.Array:
    """x: (B, 3, H, W) float array -> (B, 1) float32 loss per batch element."""
    b, c, h, w = x.shape
    assert c == 3, "L_color expects exactly 3 channels (r, g, b)"
    hw = h * w
    rows = b * 3
    itemsize = jnp.dtype(x.dtype).itemsize

    # (B, 3, H, W) -> (B*3, H*W): contiguous reshape (free).
    x2 = x.reshape(rows, hw)

    # --- row (sublane) tile: dtype sublane minimum, no extra row padding.
    sublane = {4: 8, 2: 16, 1: 32}.get(itemsize, 8)
    row_tile = sublane
    rows_pad = _round_up(rows, row_tile)
    row_grid = rows_pad // row_tile

    hw128 = _round_up(hw, 128)

    # --- v7x megacore: guarantee >=2 grid points on a parallel axis.  When
    # there is a single row tile, split the k (lane-tile) range in two and
    # emit two partial slabs per row.
    nsplit = 2 if (row_grid == 1 and hw128 >= 256) else 1

    # --- lane tile: VMEM-budget driven (~4 MiB per input buffer; with
    # default double buffering that is 8 MiB, safe under v5e's 16 MiB
    # scoped-VMEM default and tiny on v6e/v7x).
    budget_lanes = max(128, (4 * 1024 * 1024 // (row_tile * itemsize)) // 128 * 128)
    k_total = _round_up(max(_cdiv(hw128, budget_lanes), nsplit), nsplit)
    thw = _round_up(_cdiv(hw128, k_total), 128)   # ceil-based tile (may need pad)

    # Prefer an exact multiple-of-128 divisor of H*W when one exists that is
    # at least half the budgeted tile: this skips the jnp.pad copy entirely
    # for common image sizes while never collapsing to a tiny tile.
    if hw % 128 == 0:
        unit = hw // 128
        best = 0
        d = 1
        while d * d <= unit:
            if unit % d == 0:
                for dd in (d, unit // d):
                    cand = 128 * dd
                    if cand <= budget_lanes and (hw // cand) % nsplit == 0:
                        best = max(best, cand)
            d += 1
        if best * 2 >= thw:
            thw = best

    hw_pad = _round_up(hw, thw)
    k_total = hw_pad // thw
    if k_total % nsplit:
        k_total = _round_up(k_total, nsplit)
        hw_pad = k_total * thw
    k_per_split = k_total // nsplit

    # Zero padding is exact for a sum-of-squares reduction; padded rows are
    # sliced off before the sqrt.
    if rows_pad != rows or hw_pad != hw:
        x2 = jnp.pad(x2, ((0, rows_pad - rows), (0, hw_pad - hw)))

    grid = (nsplit, row_grid, k_per_split)
    kernel = functools.partial(_sumsq_kernel, nchunks=thw // 128)

    partials = pl.pallas_call(
        kernel,
        out_shape=jax.ShapeDtypeStruct((rows_pad, nsplit * 128), jnp.float32),
        grid_spec=pltpu.PrefetchScalarGridSpec(
            num_scalar_prefetch=0,
            grid=grid,
            in_specs=[pl.BlockSpec(
                (row_tile, thw),
                lambda p, i, k: (i, p * k_per_split + k))],
            out_specs=pl.BlockSpec(
                (row_tile, 128),
                lambda p, i, k: (i, p)),
        ),
        compiler_params=pltpu.CompilerParams(
            dimension_semantics=("parallel", "parallel", "arbitrary"),
        ),
    )(x2)

    # Tiny O(B) finalize in plain JAX: lane sum -> sqrt -> pairwise squared
    # diffs -> /(H*W).
    sq = jnp.sum(partials[:rows], axis=-1).reshape(b, 3)
    norms = jnp.sqrt(sq)
    pr = norms[:, 0:1]
    pg = norms[:, 1:2]
    pb = norms[:, 2:3]
    out = ((pr - pg) ** 2 + (pr - pb) ** 2 + (pb - pg) ** 2) / jnp.float32(hw)
    # Loss value kept in float32 regardless of input dtype.
    return out.astype(jnp.float32)


def _l_color_ref(x: jax.Array) -> jax.Array:
    # Pure-JAX reference mirroring the PyTorch forward.
    b, c, h, w = x.shape
    xf = x.astype(jnp.float32)
    pow_r = jnp.sqrt(jnp.sum(xf[:, 0] ** 2, axis=(1, 2)))[:, None]
    pow_g = jnp.sqrt(jnp.sum(xf[:, 1] ** 2, axis=(1, 2)))[:, None]
    pow_b = jnp.sqrt(jnp.sum(xf[:, 2] ** 2, axis=(1, 2)))[:, None]
    return ((pow_r - pow_g) ** 2 + (pow_r - pow_b) ** 2
            + (pow_b - pow_g) ** 2) / (h * w)


if __name__ == "__main__":
    key = jax.random.PRNGKey(0)
    B, C, H, W = 2, 3, 16, 16                 # NCHW, 3 channels (required by split)
    x = jax.random.uniform(key, (B, C, H, W), dtype=jnp.float32)

    out = l_color(x)
    out = jax.block_until_ready(out)

    ref = _l_color_ref(x)
    assert out.shape == (B, 1), out.shape
    assert jnp.allclose(out, ref, atol=1e-4, rtol=1e-4), (out, ref)
    print("KERNEL_OK")
</pallas_src>

<mosaic_0001>
module attributes {stable_mosaic.version = 11 : i64} {
  func.func @_sumsq_kernel(%arg0: i32, %arg1: i32, %arg2: i32, %arg3: memref<8x128xf32, #tpu.memory_space<vmem>>, %arg4: memref<8x128xf32, #tpu.memory_space<vmem>>) attributes {dimension_semantics = [#tpu.dimension_semantics<parallel>, #tpu.dimension_semantics<parallel>, #tpu.dimension_semantics<arbitrary>], iteration_bounds = array<i64: 2, 1, 1>, scalar_prefetch = 0 : i64, scratch_operands = 0 : i64, tpu.core_type = #tpu.core_type<tc>, window_params = [{transform_indices = @transform_0, window_bounds = array<i64: 8, 128>}, {transform_indices = @transform_1, window_bounds = array<i64: 8, 128>}]} {
    %c0_i32 = arith.constant 0 : i32
    %0 = arith.cmpi eq, %arg2, %c0_i32 : i32
    %1 = arith.extui %0 : i1 to i32
    %c0_i32_0 = arith.constant 0 : i32
    %2 = arith.cmpi ne, %1, %c0_i32_0 : i32
    scf.if %2 {
      %cst_6 = arith.constant 0.000000e+00 : f32
      %13 = vector.broadcast %cst_6 : f32 to vector<8x128xf32>
      %c0_7 = arith.constant 0 : index
      %c0_8 = arith.constant 0 : index
      %14 = vector.load %arg4[%c0_7, %c0_8] : memref<8x128xf32, #tpu.memory_space<vmem>>, vector<8x128xf32>
      tpu.vector_store %arg4[%c0_7, %c0_8], %13 {strides = array<i32>} : memref<8x128xf32, #tpu.memory_space<vmem>>, vector<8x128xf32>,
    } else {
    }
    %cst = arith.constant 0.000000e+00 : f32
    %3 = vector.broadcast %cst : f32 to vector<8x128xf32>
    %c0_i32_1 = arith.constant 0 : i32
    %c128_i32 = arith.constant 128 : i32
    %4 = arith.muli %c0_i32_1, %c128_i32 : i32
    %5 = tpu.assume_multiple %4, 128 : i32
    %c0 = arith.constant 0 : index
    %6 = arith.index_cast %5 : i32 to index
    %7 = vector.load %arg3[%c0, %6] : memref<8x128xf32, #tpu.memory_space<vmem>>, vector<8x128xf32>
    %8 = arith.mulf %7, %7 : vector<8x128xf32>
    %9 = arith.addf %3, %8 : vector<8x128xf32>
    %c1_i32 = arith.constant 1 : i32
    %c0_2 = arith.constant 0 : index
    %c0_3 = arith.constant 0 : index
    %10 = vector.load %arg4[%c0_2, %c0_3] : memref<8x128xf32, #tpu.memory_space<vmem>>, vector<8x128xf32>
    %11 = arith.addf %10, %9 : vector<8x128xf32>
    %c0_4 = arith.constant 0 : index
    %c0_5 = arith.constant 0 : index
    %12 = vector.load %arg4[%c0_4, %c0_5] : memref<8x128xf32, #tpu.memory_space<vmem>>, vector<8x128xf32>
    tpu.vector_store %arg4[%c0_4, %c0_5], %11 {strides = array<i32>} : memref<8x128xf32, #tpu.memory_space<vmem>>, vector<8x128xf32>,
    return
  }
  func.func @transform_0(%arg0: i32, %arg1: i32, %arg2: i32) -> (i32, i32) {
    %c1_i32 = arith.constant 1 : i32
    %0 = arith.muli %arg0, %c1_i32 : i32
    %1 = arith.addi %0, %arg2 : i32
    %c0_i32 = arith.constant 0 : i32
    return %arg1, %1 : i32, i32
  }
  func.func @transform_1(%arg0: i32, %arg1: i32, %arg2: i32) -> (i32, i32) {
    %c0_i32 = arith.constant 0 : i32
    return %arg1, %arg0 : i32, i32
  }
}

</mosaic_0001>

<bundles_post_ra>
// kernel: tpu_custom_call.1
= control target key start
LH: loop header
LB: loop body
LE: loop exit
PB: predicated region body
PF: predicated region fallthrough
CT: control target
= control target key end

     0   :  { %6 = vsyncpa [#allocation3], 0  ;;  %s648_s0 = inlined_call_operand.hbm [shape: f32[8,256], index: 0, kind: input, shape index: {}]   ;;  %s649_s1 = inlined_call_operand.hbm [shape: f32[8,256], index: 1, kind: output, shape index: {}]  }
   0x1   :  { %8 = vsyncpa [#allocation3 + $0x1], 0 }
   0x2   :  { %9 = vsyncpa [#allocation4], 0 }
   0x3   :  { %11 = vsyncpa [#allocation4 + $0x1], 0  ;;  %s476_s6 = smov 0   ;;  %s478_s7 = smov 0  }
   0x4   :  { %s480_s8 = smov 0   ;;  %s482_s9 = smov 0  }
   0x5   :  { %s484_s10 = smov 0   ;;  %s486_s11 = smov 0  }
   0x6 LB: > { %s274_s12 = sadd.s32 4294967295, %s462_s11   ;;  %s275_s13 = sadd.s32 4294967294, %s462_s11   ;;  %s462_s11 = sphi %s486_s11, %s17_s11   ;;  %s458_s10 = sphi %s484_s10, %s665_s10   ;;  %s454_s9 = sphi %s482_s9, %s664_s9   ;;  %s450_s8 = sphi %s480_s8, %s663_s8   ;;  %s446_s7 = sphi %s478_s7, %s662_s7   ;;  %s442_s6 = sphi %s476_s6, %s661_s6  }
   0x7   : > { %s36_s14 = sadd.s32 1, %s458_s10  ;;  %s47_s15 = sadd.s32 1, %s450_s8 }
   0x8   : > { %p38_p0 = scmp.ge.s32.totalorder %s36_s14, 2  ;;  %p54_p1 = scmp.ne.s32.totalorder %s450_s8, %s446_s7 }
   0x9   : > { %p55_p2 = scmp.eq.s32.totalorder %s462_s11, 0  ;;  %p60_p3 = scmp.ne.s32.totalorder %s446_s7, %s442_s6 }
   0xa   : > { %s667_s14 = smov (%p38_p0, %s36_s14), 0  ;;  %p61_p5 = scmp.eq.s32.totalorder %s274_s12, 0 }
   0xb   : > { %p517_p4 = por %p55_p2, %p54_p1  ;;  %s43_s17 = ssub.s32 %s458_s10, %s667_s14 }
   0xc   : > { %p86_p6 = scmp.eq.s32.totalorder %s274_s12, 1  ;;  %p45_p7 = scmp.eq.s32.totalorder %s43_s17, 0 }
   0xd   : > { %p523_p8 = por %p61_p5, %p60_p3  ;;  %p92_p10 = scmp.eq.s32.totalorder %s275_s13, 1 }
   0xe   : > { %p527_p9 = por %p86_p6, %p54_p1  ;;  %p299_p13 = scmp.lt.s32.totalorder %s462_s11, 2 }
   0xf   : > { %s532_s20 = scalar_select %p45_p7, %s450_s8, %s47_s15  }
  0x10   : > { %s653_s19 = scalar_select %p527_p9, 1, 0 }
  0x11   : > { %p534_p11 = por %p92_p10, %p60_p3  ;;  %s112_s22 = sand.u32 1, %s450_s8  }
  0x12   : > { %s278_s23 = sshll.u32 %s112_s22, 3  ;;  %s279_s24 = sshll.u32 %s458_s10, 7 }
  0x13   : > { %s654_s21 = scalar_select %p534_p11, 1, 0 }
  0x14   : > { %s545_s27 = scalar_lea.hbm %s648_s0, %s279_s24  ;;  %s116_s28 = scalar_lea.vmem [#allocation2], %s278_s23 }
  0x15   : > { %s126_s29 = sshll.u32 %s116_s28, 4  ;;  %p551_p0 = pnand %p299_p13, %p517_p4  ;;  %s547_s29 = int_to_ptr.vmem [resolvable:$true] %s126_s29 }
  0x16   : > { %s113_s2 = scalar_lea.sflag [#allocation3], %s112_s22  ;;  %s350_s3 = scalar_lea.hbm %s545_s27, 128 }
  0x17   : > { %p351_p3 = scmp.ne.s32.totalorder %s545_s27, %s350_s3  ;;  %p352_p5 = pneg %p551_p0 }
  0x18   : > { %s355_s12 = scalar_lea.hbm %s648_s0, 256  ;;  %p356_p4 = scmp.lt.u32.totalorder %s545_s27, %s648_s0 }
  0x19   : > { %p353_p6 = pnand %p352_p5, %p351_p3  ;;  %p357_p10 = scmp.lt.u32.totalorder %s355_s12, %s350_s3 }
  0x1a   : > { %p359_p12 = scmp.lt.u32.totalorder %s350_s3, %s545_s27 }
  0x1b   : > { %p354_p7 = pneg %p353_p6  ;;  %p358_p13 = por %p357_p10, %p356_p4 }
  0x1d   : > { %p360_p1 = por %p359_p12, %p358_p13 }
  0x1f   : > { %p361_p2 = pnand %p360_p1, %p354_p7 }
  0x21   : > { %364 = shalt.err (!%p361_p2)
}
  0x22   : > { %s365_s16 = scalar_lea.vmem %s547_s29, 128  ;;  %s464_s17 = smov [#allocation2]  }
  0x23   : > { %p366_p3 = scmp.ne.s32.totalorder %s547_s29, %s365_s16  ;;  %s370_s22 = sshll.u32 %s464_s17, 4  ;;  %s371_s22 = int_to_ptr.vmem [resolvable:$false] %s370_s22 }
  0x24   : > { %s372_s23 = scalar_lea.vmem %s371_s22, 256  ;;  %p373_p9 = scmp.lt.s32.totalorder %s547_s29, %s371_s22 }
  0x25   : > { %p368_p6 = pnand %p366_p3, %p352_p5  ;;  %p374_p4 = scmp.lt.s32.totalorder %s372_s23, %s365_s16 }
  0x27   : > { %p369_p11 = pneg %p368_p6  ;;  %p375_p10 = por %p374_p4, %p373_p9 }
  0x29   : > { %p376_p12 = pnand %p375_p10, %p369_p11 }
  0x2b   : > { %379 = shalt.err (!%p376_p12)
}
  0x2c   : > { %294 = dma.hbm_to_vmem [thread:$0]  (!%p551_p0), %s545_s27, 128, %s547_s29, %s113_s2  }
  0x2d   : > { %p656_p1 = scmp.lt.s32.totalorder %s462_s11, 3  ;;  %p657_p2 = scmp.ge.s32.totalorder %s462_s11, 1 }
  0x2f   : > { %p132_p5 = pnand %p657_p2, %p656_p1 }
  0x30   : > { %s587_s24 = sand.u32 (!%p132_p5), 1, %s446_s7  }
  0x31   : > { %135 = sbr.rel (%p132_p5) target bundleno = 83 (0x53), region = 24  ;;  %s281_s25 = sshll.u32 (!%p132_p5), %s587_s24, 3 }
  0x32   : > { %s138_s26 = scalar_lea.sflag (!%p132_p5), [#allocation3], %s587_s24  ;;  %s141_s28 = scalar_lea.vmem (!%p132_p5), [#allocation2], %s281_s25 }
  0x38   : > { %433 = dma.done.wait (%p523_p8), %s138_s26, 128  }
  0x39   : > { %435 = vsyncadd (%p523_p8), %s138_s26, 4294967168  ;;  %v166_v0 = vld [vmem:[%s141_s28] sm:$0xff]  ;;  %s284_s27 = sshll.u32 %s454_s9, 7  ;;  %s159_s29 = scalar_lea.vmem [#allocation5], %s281_s25 }
  0x3a   : > { %s188_s30 = sshll.u32 %s159_s29, 4  ;;  %v167_v1 = vmul.f32 %v166_v0, %v166_v0  ;;  %s599_s4 = scalar_lea.hbm %s649_s1, %s284_s27  ;;  %s601_s30 = int_to_ptr.vmem [resolvable:$true] %s188_s30 }
  0x3b   : > { %s173_s18 = scalar_lea.sflag [#allocation4], %s587_s24  ;;  %s380_s5 = scalar_lea.vmem %s601_s30, 128 }
  0x3c   : > { %171 = vst [vmem:[%s159_s29] sm:$0xff] %v167_v1  ;;  %p381_p8 = scmp.ne.s32.totalorder %s601_s30, %s380_s5  ;;  %p658_p9 = scmp.ne.s32.totalorder %s653_s19, 0 }
  0x3d   : > { %s465_s9 = smov [#allocation5]  }
  0x3e   : > { %p382_p11 = pnand %p381_p8, %p658_p9  ;;  %s384_s12 = sshll.u32 %s465_s9, 4  ;;  %s385_s12 = int_to_ptr.vmem [resolvable:$false] %s384_s12 }
  0x3f   : > { %s386_s13 = scalar_lea.vmem %s385_s12, 256  ;;  %p387_p7 = scmp.lt.s32.totalorder %s601_s30, %s385_s12 }
  0x40   : > { %p383_p0 = pneg %p382_p11  ;;  %p388_p13 = scmp.lt.s32.totalorder %s386_s13, %s380_s5 }
  0x42   : > { %p389_p3 = por %p388_p13, %p387_p7 }
  0x44   : > { %p390_p6 = pnand %p389_p3, %p383_p0 }
  0x46   : > { %393 = shalt.err (!%p390_p6)
}
  0x47   : > { %s394_s15 = scalar_lea.hbm %s599_s4, 128  ;;  %s398_s22 = scalar_lea.hbm %s649_s1, 256 }
  0x48   : > { %p395_p4 = scmp.ne.s32.totalorder %s599_s4, %s394_s15  ;;  %p399_p1 = scmp.lt.u32.totalorder %s599_s4, %s649_s1 }
  0x49   : > { %p400_p2 = scmp.lt.u32.totalorder %s398_s22, %s394_s15  ;;  %p402_p8 = scmp.lt.u32.totalorder %s394_s15, %s599_s4 }
  0x4a   : > { %p396_p10 = pnand %p395_p4, %p658_p9 }
  0x4b   : > { %p401_p5 = por %p400_p2, %p399_p1 }
  0x4c   : > { %p397_p12 = pneg %p396_p10 }
  0x4d   : > { %p403_p11 = por %p402_p8, %p401_p5 }
  0x4f   : > { %p404_p0 = pnand %p403_p11, %p397_p12 }
  0x51   : > { %407 = shalt.err (!%p404_p0)
}
  0x52   : > { %289 = dma.vmem_to_hbm [thread:$0]  (%p658_p9), %s601_s30, 128, %s599_s4, %s173_s18  }
  0x53 PF: > { %s200_s25 = sand.u32 1, %s442_s6   ;;  %p659_p7 = scmp.ne.s32.totalorder %s654_s21, 0 }
  0x54   : > { %p660_p13 = scmp.ge.s32.totalorder %s462_s11, 2  ;;  %s201_s26 = scalar_lea.sflag [#allocation4], %s200_s25 }
  0x56   : > { %p296_p3 = pnand %p660_p13, %p659_p7 }
  0x58   : > { %437 = dma.done.wait (!%p296_p3), %s201_s26, 128  }
  0x59   : > { %439 = vsyncadd (!%p296_p3), %s201_s26, 4294967168  ;;  %s17_s11 = sadd.s32 1, %s462_s11   ;;  %s661_s6 = smov %s446_s7 }
  0x5a   : > { %p14_p6 = scmp.ge.s32.totalorder %s17_s11, 4   ;;  %s662_s7 = smov %s450_s8 }
  0x5b   : > { %s663_s8 = smov %s532_s20  ;;  %s664_s9 = smov %s458_s10 }
  0x5c   : > { %s665_s10 = smov %s667_s14  ;;  %16 = sbr.rel (!%p14_p6) target bundleno = 6 (0x6), region = 73 }
  0x63   :  { %206 = vsyncpa [#allocation3], 1 }
  0x64   :  { %208 = vsyncpa [#allocation3 + $0x1], 1 }
  0x65   :  { %209 = vsyncpa [#allocation4], 1 }
  0x66   :  { %211 = vsyncpa [#allocation4 + $0x1], 1 }

</bundles_post_ra>
